<compile_context>
chip_gen: v7x
topology: tpu7x:2x2x1
jax: 0.10.0
libtpu: 0.0.40
codegen_flags: <defaults>
</compile_context>

<pallas_src>
import functools

import jax
import jax.numpy as jnp
from jax import lax
from jax.experimental import pallas as pl
from jax.experimental.pallas import tpu as pltpu


def _round_up(n, m):
    return ((n + m - 1) // m) * m


def prepare_qkv_weight(w_q, w_k, w_v, *, compute_dtype=jnp.bfloat16):
    """One-time weight preparation (hoisted out of the per-call path).

    Folds the 1/sqrt(d_model) score scale into W_q, zero-pads each PyTorch-layout
    (out_features, in_features) weight to a lane-dense (Dp, Dp), transposes to
    (in, out) so the kernel's MXU RHS is already (K, N), and concatenates into a
    single (Dp, 3*Dp) compute-dtype matrix -> one weight push per q-tile.
    """
    d_model = w_q.shape[0]
    d_pad = _round_up(d_model, 128)
    scale = 1.0 / (d_model ** 0.5)

    def pad_t(w):
        wt = jnp.asarray(w).T  # (in_features, out_features)
        return jnp.pad(wt, ((0, d_pad - d_model), (0, d_pad - d_model)))

    w_fused = jnp.concatenate([pad_t(w_q * scale), pad_t(w_k), pad_t(w_v)], axis=1)
    return w_fused.astype(compute_dtype)  # (Dp, 3*Dp)


@functools.partial(jax.jit, static_argnames=("compute_dtype",))
def self_attention(x, w_qkv, *, compute_dtype=jnp.bfloat16):
    """x: (seq_len, d_model); w_qkv: (Dp, 3*Dp) from prepare_qkv_weight()."""
    seq_len, d_model = x.shape
    d_pad = w_qkv.shape[0]
    assert w_qkv.shape[1] == 3 * d_pad

    # q-tile size: whole (padded) sequence for small S, 512-row tiles for larger S.
    tq = min(512, _round_up(seq_len, 8))
    s_pad = _round_up(seq_len, tq)
    n_q = s_pad // tq
    needs_kv_mask = s_pad != seq_len

    x_pad = jnp.pad(x, ((0, s_pad - seq_len), (0, d_pad - d_model)))
    x_pad = x_pad.astype(compute_dtype)
    out_dtype = x.dtype

    def kernel(xq_ref, xkv_ref, w_ref, o_ref):
        cdt = xq_ref.dtype

        # Projections: weight is already (in, out) -> MXU RHS is (K, N), no transpose.
        # 1/sqrt(d_model) is folded into the Q columns of w_ref.
        q = jnp.dot(xq_ref[...], w_ref[:, :d_pad],
                    preferred_element_type=jnp.float32)          # (tq, Dp) f32
        kv = jnp.dot(xkv_ref[...], w_ref[:, d_pad:],
                     preferred_element_type=jnp.float32)         # (S, 2*Dp) f32
        k = kv[:, :d_pad]
        v = kv[:, d_pad:]

        # sims = q @ k^T : contract both last axes directly (no materialized transpose).
        sims = lax.dot_general(
            q.astype(cdt), k.astype(cdt), (((1,), (1,)), ((), ())),
            preferred_element_type=jnp.float32,
        )  # (tq, S) f32

        if needs_kv_mask:
            kv_idx = lax.broadcasted_iota(jnp.int32, sims.shape, 1)
            sims = jnp.where(kv_idx < seq_len, sims, -1e30)

        # Numerically stable softmax: f32 VPU/EUP math, divide -> EUP reciprocal.
        m = jnp.max(sims, axis=-1, keepdims=True)
        e = jnp.exp(sims - m)
        denom = jnp.sum(e, axis=-1, keepdims=True)
        p = e * pl.reciprocal(denom, approx=True)

        # attention_scores = softmax(scaled_sims) @ v  (bf16 operands, f32 accumulate).
        out = jnp.dot(p.astype(cdt), v.astype(cdt), preferred_element_type=jnp.float32)
        o_ref[...] = out.astype(o_ref.dtype)

    out_pad = pl.pallas_call(
        kernel,
        out_shape=jax.ShapeDtypeStruct((s_pad, d_pad), out_dtype),
        grid=(n_q,),
        in_specs=[
            pl.BlockSpec((tq, d_pad), lambda i: (i, 0)),         # q rows: tiled
            pl.BlockSpec((s_pad, d_pad), lambda i: (0, 0)),      # K/V source: resident
            pl.BlockSpec((d_pad, 3 * d_pad), lambda i: (0, 0)),  # fused weight: resident
        ],
        out_specs=pl.BlockSpec((tq, d_pad), lambda i: (i, 0)),
        compiler_params=pltpu.CompilerParams(
            dimension_semantics=("parallel",),
        ),
    )(x_pad, x_pad, w_qkv)

    return out_pad[:seq_len, :d_model].astype(x.dtype)


def reference_self_attention(x, w_q, w_k, w_v):
    q = x @ w_q.T
    k = x @ w_k.T
    v = x @ w_v.T
    sims = q @ k.T
    scaled = sims / jnp.sqrt(jnp.float32(k.shape[1]))
    p = jax.nn.softmax(scaled, axis=-1)
    return p @ v


if __name__ == "__main__":
    d_model = 32
    seq_len = 8  # row_dim=0, col_dim=1, matching the PyTorch module's 2-D usage

    key = jax.random.PRNGKey(0)
    kx, kq, kk, kv = jax.random.split(key, 4)

    # Deterministic init (nn.Linear-style uniform(-1/sqrt(d), 1/sqrt(d))).
    bound = 1.0 / (d_model ** 0.5)
    x = jax.random.normal(kx, (seq_len, d_model), dtype=jnp.float32)
    w_q = jax.random.uniform(kq, (d_model, d_model), jnp.float32, -bound, bound)
    w_k = jax.random.uniform(kk, (d_model, d_model), jnp.float32, -bound, bound)
    w_v = jax.random.uniform(kv, (d_model, d_model), jnp.float32, -bound, bound)

    # One-time weight prep (static between calls); jitted forward call.
    w_qkv = prepare_qkv_weight(w_q, w_k, w_v)
    out = self_attention(x, w_qkv)
    out = jax.block_until_ready(out)

    ref = reference_self_attention(x, w_q, w_k, w_v)
    assert out.shape == (seq_len, d_model)
    # bf16 MXU operands + approx reciprocal -> compare at bf16-level tolerance.
    assert jnp.allclose(out, ref, atol=2e-2, rtol=2e-2), (
        f"max abs err {jnp.max(jnp.abs(out - ref))}"
    )

    print("KERNEL_OK")
</pallas_src>

<mosaic_0001>
module attributes {stable_mosaic.version = 11 : i64} {
  func.func @kernel(%arg0: i32, %arg1: memref<8x128xbf16, #tpu.memory_space<vmem>>, %arg2: memref<8x128xbf16, #tpu.memory_space<vmem>>, %arg3: memref<128x384xbf16, #tpu.memory_space<vmem>>, %arg4: memref<8x128xf32, #tpu.memory_space<vmem>>) attributes {dimension_semantics = [#tpu.dimension_semantics<parallel>], iteration_bounds = array<i64: 1>, scalar_prefetch = 0 : i64, scratch_operands = 0 : i64, tpu.core_type = #tpu.core_type<tc>, window_params = [{transform_indices = @transform_0, window_bounds = array<i64: 8, 128>}, {pipeline_mode = #tpu.pipeline_mode<synchronous>, transform_indices = @transform_1, window_bounds = array<i64: 8, 128>}, {pipeline_mode = #tpu.pipeline_mode<synchronous>, transform_indices = @transform_2, window_bounds = array<i64: 128, 384>}, {transform_indices = @transform_3, window_bounds = array<i64: 8, 128>}]} {
    %c0 = arith.constant 0 : index
    %c0_0 = arith.constant 0 : index
    %0 = vector.load %arg1[%c0, %c0_0] : memref<8x128xbf16, #tpu.memory_space<vmem>>, vector<8x128xbf16>
    %c0_1 = arith.constant 0 : index
    %c0_2 = arith.constant 0 : index
    %1 = vector.load %arg3[%c0_1, %c0_2] : memref<128x384xbf16, #tpu.memory_space<vmem>>, vector<128x128xbf16>
    %cst = arith.constant dense<0.000000e+00> : vector<8x128xf32>
    %2 = tpu.matmul %0, %1, %cst {dimension_numbers = #tpu.dot_dimension_numbers<[1], [0], [0], [1], [0, 0, 1, 1], [], []>} : vector<8x128xbf16>, vector<128x128xbf16>, vector<8x128xf32> -> vector<8x128xf32>
    %c0_3 = arith.constant 0 : index
    %c0_4 = arith.constant 0 : index
    %3 = vector.load %arg2[%c0_3, %c0_4] : memref<8x128xbf16, #tpu.memory_space<vmem>>, vector<8x128xbf16>
    %c0_5 = arith.constant 0 : index
    %c128 = arith.constant 128 : index
    %4 = vector.load %arg3[%c0_5, %c128] : memref<128x384xbf16, #tpu.memory_space<vmem>>, vector<128x256xbf16>
    %cst_6 = arith.constant dense<0.000000e+00> : vector<8x256xf32>
    %5 = tpu.matmul %3, %4, %cst_6 {dimension_numbers = #tpu.dot_dimension_numbers<[1], [0], [0], [1], [0, 0, 1, 1], [], []>} : vector<8x128xbf16>, vector<128x256xbf16>, vector<8x256xf32> -> vector<8x256xf32>
    %6 = vector.extract_strided_slice %5 {offsets = [0, 0], sizes = [8, 128], strides = [1, 1]} : vector<8x256xf32> to vector<8x128xf32>
    %7 = vector.extract_strided_slice %5 {offsets = [0, 128], sizes = [8, 128], strides = [1, 1]} : vector<8x256xf32> to vector<8x128xf32>
    %8 = arith.truncf %2 : vector<8x128xf32> to vector<8x128xbf16>
    %9 = arith.truncf %6 : vector<8x128xf32> to vector<8x128xbf16>
    %cst_7 = arith.constant dense<0.000000e+00> : vector<8x8xf32>
    %10 = tpu.matmul %8, %9, %cst_7 {dimension_numbers = #tpu.dot_dimension_numbers<[1], [1], [0], [0], [0, 0, 1, 0], [], []>} : vector<8x128xbf16>, vector<8x128xbf16>, vector<8x8xf32> -> vector<8x8xf32>
    %cst_8 = arith.constant dense<0xFF800000> : vector<8xf32>
    %11 = vector.multi_reduction <maximumf>, %10, %cst_8 [1] : vector<8x8xf32> to vector<8xf32>
    %12 = vector.shape_cast %11 : vector<8xf32> to vector<8x1xf32>
    %13 = vector.broadcast %12 : vector<8x1xf32> to vector<8x8xf32>
    %14 = arith.subf %10, %13 : vector<8x8xf32>
    %15 = math.exp %14 : vector<8x8xf32>
    %cst_9 = arith.constant dense<0.000000e+00> : vector<8xf32>
    %16 = vector.multi_reduction <add>, %15, %cst_9 [1] : vector<8x8xf32> to vector<8xf32>
    %17 = vector.shape_cast %16 : vector<8xf32> to vector<8x1xf32>
    %18 = tpu.reciprocal %17 {approx = true} : vector<8x1xf32> -> vector<8x1xf32>
    %19 = vector.broadcast %18 : vector<8x1xf32> to vector<8x8xf32>
    %20 = arith.mulf %15, %19 : vector<8x8xf32>
    %21 = arith.truncf %20 : vector<8x8xf32> to vector<8x8xbf16>
    %22 = arith.truncf %7 : vector<8x128xf32> to vector<8x128xbf16>
    %cst_10 = arith.constant dense<0.000000e+00> : vector<8x128xf32>
    %23 = tpu.matmul %21, %22, %cst_10 {dimension_numbers = #tpu.dot_dimension_numbers<[1], [0], [0], [1], [0, 0, 1, 1], [], []>} : vector<8x8xbf16>, vector<8x128xbf16>, vector<8x128xf32> -> vector<8x128xf32>
    %c0_11 = arith.constant 0 : index
    %c0_12 = arith.constant 0 : index
    %24 = vector.load %arg4[%c0_11, %c0_12] : memref<8x128xf32, #tpu.memory_space<vmem>>, vector<8x128xf32>
    tpu.vector_store %arg4[%c0_11, %c0_12], %23 {strides = array<i32>} : memref<8x128xf32, #tpu.memory_space<vmem>>, vector<8x128xf32>,
    return
  }
  func.func @transform_0(%arg0: i32) -> (i32, i32) {
    %c0_i32 = arith.constant 0 : i32
    %c0_i32_0 = arith.constant 0 : i32
    return %arg0, %c0_i32 : i32, i32
  }
  func.func @transform_1(%arg0: i32) -> (i32, i32) {
    %c0_i32 = arith.constant 0 : i32
    %c0_i32_0 = arith.constant 0 : i32
    %c0_i32_1 = arith.constant 0 : i32
    return %c0_i32, %c0_i32_0 : i32, i32
  }
  func.func @transform_2(%arg0: i32) -> (i32, i32) {
    %c0_i32 = arith.constant 0 : i32
    %c0_i32_0 = arith.constant 0 : i32
    %c0_i32_1 = arith.constant 0 : i32
    return %c0_i32, %c0_i32_0 : i32, i32
  }
  func.func @transform_3(%arg0: i32) -> (i32, i32) {
    %c0_i32 = arith.constant 0 : i32
    %c0_i32_0 = arith.constant 0 : i32
    return %arg0, %c0_i32 : i32, i32
  }
}

</mosaic_0001>

<bundles_post_ra>
// kernel: self_attention.1
= control target key start
LH: loop header
LB: loop body
LE: loop exit
PB: predicated region body
PF: predicated region fallthrough
CT: control target
= control target key end

     0   :  { %8 = vsyncpa [#allocation3], 0  ;;  %s629_s0 = inlined_call_operand.vmem [shape: bf16[8,128], index: 0, kind: input, shape index: {}, may-alias: {0,1}]   ;;  %s630_s1 = inlined_call_operand.vmem [shape: bf16[8,128], index: 1, kind: input, shape index: {}, may-alias: {0,1}]   ;;  %s631_s2 = inlined_call_operand.hbm [shape: bf16[128,384], index: 2, kind: input, shape index: {}]   ;;  %s632_s3 = inlined_call_operand.hbm [shape: f32[8,128], index: 3, kind: output, shape index: {}]  }
   0x1   :  { %9 = vsyncpa [#allocation4], 0  ;;  %s553_s12 = smov [#allocation2]   ;;  %s505_s16 = scalar_lea.hbm %s631_s2, 3072 }
   0x2   :  { %s19_s13 = sshll.u32 %s553_s12, 4  ;;  %p506_p0 = scmp.ne.s32.totalorder %s631_s2, %s505_s16  ;;  %s20_s13 = int_to_ptr.vmem [resolvable:$true] %s19_s13 }
   0x3   :  { %p509_p1 = scmp.lt.u32.totalorder %s505_s16, %s631_s2 }
   0x5   :  { %p511_p2 = pnand %p509_p1, %p506_p0 }
   0x7   :  { %514 = shalt.err (!%p511_p2)
}
   0x8   :  { %s515_s21 = scalar_lea.vmem %s20_s13, 3072  ;;  %p520_p4 = scmp.lt.s32.totalorder %s20_s13, %s20_s13 }
   0x9   :  { %p516_p3 = scmp.ne.s32.totalorder %s20_s13, %s515_s21  ;;  %p521_p5 = scmp.lt.s32.totalorder %s515_s21, %s515_s21 }
   0xb   :  { %p522_p6 = por %p521_p5, %p520_p4 }
   0xd   :  { %p523_p7 = pnand %p522_p6, %p516_p3 }
   0xf   :  { %526 = shalt.err (!%p523_p7)
}
  0x10   :  { %s554_s22 = smov 192   ;;  %s555_s23 = smov 12  }
  0x11   :  { %25 = dma.hbm_to_vmem [thread:$0]  %s631_s2, 3072, %s20_s13, [#allocation3], %s554_s22, %s554_s22, %s555_s23  }
  0x12   :  { %549 = dma.done.wait [#allocation3], 3072  }
  0x13   :  { %550 = vsyncadd [#allocation3], 4294964224  ;;  %v556_v0 = vmov 0.0   ;;  %v557_v1 = vmov 0   ;;  %vm558_vm0 = vmmov 0   ;;  %vm332_vm1 = vcmask 1043456  }
  0x14   :  { %430 = vmatprep.subr.bf16.mxu0 %v556_v0  ;;  %264 = vmatprep.mubr.bf16.mxu1 %v557_v1  ;;  %v469_v2 = vld [vmem:[#allocation2 + $0x8] ss:$12 sps:$4 sm:$0xff]   ;;  %v471_v3 = vld [vmem:[#allocation2 + $0x4] ss:$12 sps:$4 sm:$0xff]   ;;  %v472_v4 = vld [vmem:[#allocation2 + $0x20] ss:$12 sps:$4 sm:$0xff]  }
  0x15   :  { %446 = vmatprep.mubr.msk.bf16.mxu0 %vm558_vm0, %v556_v0  ;;  %232 = vmatprep.subr.bf16.mxu1 %v469_v2  ;;  %v474_v5 = vld [vmem:[#allocation2 + $0x1c] ss:$12 sps:$4 sm:$0xff]   ;;  %v475_v6 = vld [vmem:[#allocation2] ss:$12 sps:$4 sm:$0xff]   ;;  %v476_v7 = vld [vmem:[#allocation2 + $0x38] ss:$12 sps:$4 sm:$0xff]  }
  0x16   :  { %233 = vmatpush1.bf16.msra.mxu1 %v471_v3  ;;  %431 = vmatpush3.bf16.msra.mxu0 %v475_v6  ;;  %v479_v8 = vld [vmem:[#allocation2 + $0x18] ss:$12 sps:$4 sm:$0xff]   ;;  %v478_v9 = vld [vmem:[#allocation2 + $0x34] ss:$12 sps:$4 sm:$0xff]   ;;  %v480_v10 = vld [vmem:[#allocation2 + $0x50] ss:$12 sps:$4 sm:$0xff]  }
  0x17   :  { %234 = vmatprep.subr.bf16.mxu1 %v472_v4  ;;  %432 = vmatprep.subr.bf16.mxu0 %v556_v0  ;;  %v483_v11 = vld [vmem:[#allocation2 + $0x30] ss:$12 sps:$4 sm:$0xff]   ;;  %v482_v12 = vld [vmem:[#allocation2 + $0x4c] ss:$12 sps:$4 sm:$0xff]   ;;  %v484_v13 = vld [vmem:[#allocation2 + $0x68] ss:$12 sps:$4 sm:$0xff]  }
  0x18   :  { %v487_v14 = vld [vmem:[#allocation2 + $0x48] ss:$12 sps:$4 sm:$0xff]   ;;  %v486_v15 = vld [vmem:[#allocation2 + $0x64] ss:$12 sps:$4 sm:$0xff]   ;;  %v488_v16 = vld [vmem:[#allocation2 + $0x80] ss:$12 sps:$4 sm:$0xff]  }
  0x19   :  { %v491_v17 = vld [vmem:[#allocation2 + $0x60] ss:$12 sps:$4 sm:$0xff]   ;;  %v490_v18 = vld [vmem:[#allocation2 + $0x7c] ss:$12 sps:$4 sm:$0xff]   ;;  %v492_v19 = vld [vmem:[#allocation2 + $0x98] ss:$12 sps:$4 sm:$0xff]  }
  0x1a   :  { %235 = vmatpush1.bf16.msra.mxu1 %v474_v5  ;;  %433 = vmatpush3.bf16.msra.mxu0 %v479_v8  ;;  %v495_v20 = vld [vmem:[#allocation2 + $0x78] ss:$12 sps:$4 sm:$0xff]   ;;  %v494_v21 = vld [vmem:[#allocation2 + $0x94] ss:$12 sps:$4 sm:$0xff]   ;;  %v496_v22 = vld [vmem:[#allocation2 + $0xb0] ss:$12 sps:$4 sm:$0xff]  }
  0x1b   :  { %236 = vmatprep.subr.bf16.mxu1 %v476_v7  ;;  %434 = vmatprep.subr.bf16.mxu0 %v556_v0  ;;  %v499_v23 = vld [vmem:[#allocation2 + $0x90] ss:$12 sps:$4 sm:$0xff]   ;;  %v498_v24 = vld [vmem:[#allocation2 + $0xac] ss:$12 sps:$4 sm:$0xff]   ;;  %v500_v25 = vld [vmem:[#allocation2 + $0xa8] ss:$12 sps:$4 sm:$0xff]  }
  0x1c   :  { %v135_v26 = vld [vmem:[%s630_s1] sm:$0xf]  ;;  %vm315_vm2 = vcmask 64512  }
  0x1d   :  { %v30_v27 = vld [vmem:[%s629_s0] sm:$0xf]  ;;  %s559_s0 = smov [#allocation5]  }
  0x1e   :  { %237 = vmatpush1.bf16.msra.mxu1 %v478_v9  ;;  %435 = vmatpush3.bf16.msra.mxu0 %v483_v11  ;;  %s383_s1 = sshll.u32 %s559_s0, 4  ;;  %s384_s1 = int_to_ptr.vmem [resolvable:$true] %s383_s1 }
  0x1f   :  { %238 = vmatprep.subr.bf16.mxu1 %v480_v10  ;;  %436 = vmatprep.subr.bf16.mxu0 %v556_v0  ;;  %s527_s29 = scalar_lea.vmem %s384_s1, 128  ;;  %p532_p9 = scmp.lt.s32.totalorder %s384_s1, %s384_s1 }
  0x20   :  { %p528_p8 = scmp.ne.s32.totalorder %s384_s1, %s527_s29  ;;  %p533_p10 = scmp.lt.s32.totalorder %s527_s29, %s527_s29 }
  0x22   :  { %239 = vmatpush1.bf16.msra.mxu1 %v482_v12  ;;  %437 = vmatpush3.bf16.msra.mxu0 %v487_v14  ;;  %p534_p11 = por %p533_p10, %p532_p9 }
  0x23   :  { %240 = vmatprep.subr.bf16.mxu1 %v484_v13  ;;  %438 = vmatprep.subr.bf16.mxu0 %v556_v0 }
  0x24   :  { %p535_p12 = pnand %p534_p11, %p528_p8 }
  0x26   :  { %241 = vmatpush1.bf16.msra.mxu1 %v486_v15  ;;  %439 = vmatpush3.bf16.msra.mxu0 %v491_v17 }
  0x27   :  { %242 = vmatprep.subr.bf16.mxu1 %v488_v16  ;;  %440 = vmatprep.subr.bf16.mxu0 %v556_v0 }
  0x2a   :  { %243 = vmatpush1.bf16.msra.mxu1 %v490_v18  ;;  %441 = vmatpush3.bf16.msra.mxu0 %v495_v20 }
  0x2b   :  { %244 = vmatprep.subr.bf16.mxu1 %v492_v19  ;;  %442 = vmatprep.subr.bf16.mxu0 %v556_v0 }
  0x2e   :  { %245 = vmatpush1.bf16.msra.mxu1 %v494_v21  ;;  %443 = vmatpush3.bf16.msra.mxu0 %v499_v23 }
  0x2f   :  { %246 = vmatprep.subr.bf16.mxu1 %v496_v22  ;;  %444 = vmatprep.subr.bf16.mxu0 %v556_v0 }
  0x32   :  { %247 = vmatpush1.bf16.msra.mxu1 %v498_v24  ;;  %445 = vmatpush3.bf16.msra.mxu0 %v500_v25 }
  0x33   :  { %456 = vmatprep.subr.bf16.mxu1 %v556_v0  ;;  %450 = vmatprep.subr.bf16.mxu0 %v556_v0 }
  0x35   :  { %265 = vmatmul.mubr.bf16.vlgmr.msra.gmra.mrb[0].mxu1 %v135_v26  ;;  %447 = vmatmul.mubr.bf16.vlgmr.msra.gmra.mrb[0].mxu0 %v30_v27 }
  0x36   :  { %458 = vmatprep.mubr.msk.bf16.mxu1 %vm558_vm0, %v556_v0  ;;  %452 = vmatprep.mubr.msk.bf16.mxu0 %vm558_vm0, %v556_v0 }
 0x108   :  { %v266_v28 = vpop.f32.mrb[0].mxu1  ;;  %v129_v33 = vpop.f32.mrb[0].mxu0 }
 0x109   :  { %v274_v29 = vpack.c.bf16 %v266_v28, %v266_v28  ;;  %v268_v30 = vpop.f32.mrb[1].mxu1  ;;  %v448_v35 = vpop.f32.mrb[1].mxu0  ;;  %v273_v39 = vpack.c.bf16 %v129_v33, %v129_v33 }
 0x10a   :  { %v328_v31 = vpack.c.bf16 %v268_v30, %v268_v30  ;;  %v270_v32 = vpop.f32.mrb[2].mxu1  ;;  %v132_v37 = vpop.f32.mrb[2].mxu0 }
 0x10b   :  { %v271_v34 = vpop.f32.mrb[3].mxu1  ;;  %451 = vmatpush3.bf16.xpose.msra.mxu0 %v274_v29  ;;  %v449_v38 = vpop.f32.mrb[3].mxu0 }
 0x10c   :  { %v334_v36 = vsel %vm332_vm1, %v328_v31, 0 }
 0x10d   :  { %457 = vmatpush3.bf16.msra.mxu1 %v334_v36 }
 0x112   :  { %453 = vmatmul.mubr.bf16.vlgmr.msra.gmra.mrb[4].mxu0 %v273_v39 }
 0x1e5   :  { %v309_v40 = vpop.f32.mrb[4].mxu0 }
 0x1e6   :  { %v454_v41 = vpop.f32.mrb[5].mxu0  ;;  %v316_v42 = vsel %vm315_vm2, %v309_v40, -inf }
 0x1e7   :  { %317 = vmax.xlane.f32.xlu0 %v316_v42  ;;  %v312_v43 = vpop.f32.mrb[6].mxu0 }
 0x1e8   :  { %v455_v44 = vpop.f32.mrb[7].mxu0 }
 0x274   :  { %v318_v45 = vpop.xlane.xlu0 %317 }
 0x275   :  { %v319_v46 = vsub.f32 %v309_v40, %v318_v45 }
 0x277   :  { %v320_v47 = vmul.f32 1.442695, %v319_v46 }
 0x279   :  { %501 = vpow2.f32 %v320_v47 }
 0x283   :  { %v502_v48 = vpop.eup %501 }
 0x284   :  { %v322_v49 = vsel %vm315_vm2, %v502_v48, 0.0 }
 0x285   :  { %323 = vadd.xlane.f32.xlu0 %v322_v49 }
 0x312   :  { %v324_v50 = vpop.xlane.xlu0 %323 }
 0x313   :  { %503 = vrcp.f32 %v324_v50 }
 0x31d   :  { %v504_v51 = vpop.eup %503 }
 0x31e   :  { %v326_v52 = vmul.f32 %v504_v51, %v502_v48 }
 0x320   :  { %v327_v53 = vpack.c.bf16 %v326_v52, %v326_v52 }
 0x322   :  { %459 = vmatmul.mubr.msk.bf16.vlgmr.msra.gmra.mrb[4].mxu1 %vm315_vm2, %v327_v53 }
 0x3f5   :  { %v370_v54 = vpop.f32.mrb[4].mxu1 }
 0x3f6   :  { %376 = vst [vmem:[#allocation5] sm:$0xff] %v370_v54  ;;  %v460_v55 = vpop.f32.mrb[5].mxu1 }
 0x3f7   :  { %v373_v56 = vpop.f32.mrb[6].mxu1 }
 0x3f8   :  { %538 = shalt.err (!%p535_p12)
}
 0x3f9   :  { %s539_s5 = scalar_lea.hbm %s632_s3, 128 }
 0x3fa   :  { %p540_p13 = scmp.ne.s32.totalorder %s632_s3, %s539_s5  ;;  %p543_p0 = scmp.lt.u32.totalorder %s539_s5, %s632_s3 }
 0x3fc   :  { %p545_p1 = pnand %p543_p0, %p540_p13 }
 0x3fe   :  { %548 = shalt.err (!%p545_p1)
}
 0x3ff   :  { %386 = dma.vmem_to_hbm [thread:$0]  %s384_s1, 128, %s632_s3, [#allocation4]   ;;  %v461_v57 = vpop.f32.mrb[7].mxu1 }
 0x400   :  { %551 = dma.done.wait [#allocation4], 128  }
 0x401   :  { %552 = vsyncadd [#allocation4], 4294967168 }
 0x402   :  { %390 = vsyncpa [#allocation3], 1 }
 0x403   :  { %391 = vsyncpa [#allocation4], 1 }

</bundles_post_ra>
